<compile_context>
chip_gen: v5e
topology: v5e:2x2
jax: 0.10.0
libtpu: 0.0.40
codegen_flags: <defaults>
</compile_context>

<pallas_src>
import jax
import jax.numpy as jnp
from jax import lax
from jax.experimental import pallas as pl
from jax.experimental.pallas import tpu as pltpu

_EPS = 1e-8  # nn.CosineSimilarity default eps


def _cos_score_kernel(p1_ref, p2_ref, score_ref):
    """p1_ref, p2_ref: (D, B) feature-major; score_ref: (1, B) lane-dense."""
    p1 = p1_ref[...].astype(jnp.float32)  # (D, B)
    p2 = p2_ref[...].astype(jnp.float32)  # (D, B)

    # Per-example reductions along the sublane (feature) axis -> (1, B) lane-dense.
    dot = jnp.sum(p1 * p2, axis=0, keepdims=True)  # (1, B)
    sq1 = jnp.sum(p1 * p1, axis=0, keepdims=True)  # (1, B)
    sq2 = jnp.sum(p2 * p2, axis=0, keepdims=True)  # (1, B)

    # cos = dot / max(||p1||*||p2||, eps) == dot * rsqrt(max(sq1*sq2, eps^2))
    # (single EUP rsqrt; clamping the squared product by eps^2 is exact since
    #  sqrt is monotone). Full-precision rsqrt — keeps the 1e-5 tolerance.
    inv_norm = lax.rsqrt(jnp.maximum(sq1 * sq2, jnp.float32(_EPS * _EPS)))
    cos = dot * inv_norm

    # score = (1 + cos) * 2.5 — stored lane-dense as (1, B).
    score_ref[...] = (1.0 + cos) * 2.5


def my_loss(pre1, pre2, y):
    """Pallas TPU equivalent of the PyTorch `my_loss.forward`.

    pre1, pre2 : (B, D) float arrays
    y          : (B,)   float array of target scores
    returns (loss: scalar f32, score: (B,) f32)
    """
    B, D = pre1.shape

    # Feature-major layout so batch lands on lanes inside the kernel
    # (layout plumbing only — fused away by XLA around the pallas_call).
    p1t = jnp.transpose(pre1)  # (D, B)
    p2t = jnp.transpose(pre2)  # (D, B)

    score_2d = pl.pallas_call(
        _cos_score_kernel,
        out_shape=jax.ShapeDtypeStruct((1, B), jnp.float32),
        in_specs=[
            pl.BlockSpec(memory_space=pltpu.MemorySpace.VMEM),
            pl.BlockSpec(memory_space=pltpu.MemorySpace.VMEM),
        ],
        out_specs=pl.BlockSpec(memory_space=pltpu.MemorySpace.VMEM),
    )(p1t, p2t)

    score = score_2d[0]  # (B,)

    # Scalar MSE epilogue in the wrapper (fused by XLA) — per perf review this
    # avoids a padded (1,1) VMEM writeback + cross-sublane reduce in the kernel.
    diff = score - y.astype(jnp.float32)
    loss = jnp.mean(diff * diff)
    return loss, score


def _reference(pre1, pre2, y):
    # Pure-JAX reference mirroring the torch semantics.
    p1 = pre1.astype(jnp.float32)
    p2 = pre2.astype(jnp.float32)
    dot = jnp.sum(p1 * p2, axis=1)
    n1 = jnp.sqrt(jnp.sum(p1 * p1, axis=1))
    n2 = jnp.sqrt(jnp.sum(p2 * p2, axis=1))
    cos = dot / jnp.maximum(n1 * n2, _EPS)
    score = (1.0 + cos) * 2.5
    loss = jnp.mean((score - y.astype(jnp.float32)) ** 2)
    return loss, score


if __name__ == "__main__":
    key = jax.random.PRNGKey(0)
    k1, k2, k3 = jax.random.split(key, 3)

    B, D = 8, 32
    pre1 = jax.random.normal(k1, (B, D), dtype=jnp.float32)
    pre2 = jax.random.normal(k2, (B, D), dtype=jnp.float32)
    # STS-Benchmark labels lie in [0, 5]
    y = jax.random.uniform(k3, (B,), dtype=jnp.float32, minval=0.0, maxval=5.0)

    loss, score = jax.jit(my_loss)(pre1, pre2, y)
    jax.block_until_ready((loss, score))

    ref_loss, ref_score = _reference(pre1, pre2, y)
    assert jnp.allclose(score, ref_score, atol=1e-5, rtol=1e-5), (score, ref_score)
    assert jnp.allclose(loss, ref_loss, atol=1e-5, rtol=1e-5), (loss, ref_loss)

    print("KERNEL_OK")
</pallas_src>

<mosaic_0001>
module attributes {stable_mosaic.version = 11 : i64} {
  func.func @_cos_score_kernel(%arg0: memref<32x8xf32, #tpu.memory_space<vmem>>, %arg1: memref<32x8xf32, #tpu.memory_space<vmem>>, %arg2: memref<1x8xf32, #tpu.memory_space<vmem>>) attributes {dimension_semantics = [], scalar_prefetch = 0 : i64, scratch_operands = 0 : i64, tpu.core_type = #tpu.core_type<tc>} {
    %c0 = arith.constant 0 : index
    %c0_0 = arith.constant 0 : index
    %0 = vector.load %arg0[%c0, %c0_0] : memref<32x8xf32, #tpu.memory_space<vmem>>, vector<32x8xf32>
    %c0_1 = arith.constant 0 : index
    %c0_2 = arith.constant 0 : index
    %1 = vector.load %arg1[%c0_1, %c0_2] : memref<32x8xf32, #tpu.memory_space<vmem>>, vector<32x8xf32>
    %2 = arith.mulf %0, %1 : vector<32x8xf32>
    %cst = arith.constant dense<0.000000e+00> : vector<8xf32>
    %3 = vector.multi_reduction <add>, %2, %cst [0] : vector<32x8xf32> to vector<8xf32>
    %4 = vector.shape_cast %3 : vector<8xf32> to vector<1x8xf32>
    %5 = arith.mulf %0, %0 : vector<32x8xf32>
    %cst_3 = arith.constant dense<0.000000e+00> : vector<8xf32>
    %6 = vector.multi_reduction <add>, %5, %cst_3 [0] : vector<32x8xf32> to vector<8xf32>
    %7 = vector.shape_cast %6 : vector<8xf32> to vector<1x8xf32>
    %8 = arith.mulf %1, %1 : vector<32x8xf32>
    %cst_4 = arith.constant dense<0.000000e+00> : vector<8xf32>
    %9 = vector.multi_reduction <add>, %8, %cst_4 [0] : vector<32x8xf32> to vector<8xf32>
    %10 = vector.shape_cast %9 : vector<8xf32> to vector<1x8xf32>
    %11 = arith.mulf %7, %10 : vector<1x8xf32>
    %cst_5 = arith.constant 1.000000e-16 : f32
    %12 = vector.broadcast %cst_5 : f32 to vector<1x8xf32>
    %13 = arith.maximumf %11, %12 : vector<1x8xf32>
    %14 = math.rsqrt %13 : vector<1x8xf32>
    %15 = arith.mulf %4, %14 : vector<1x8xf32>
    %cst_6 = arith.constant 1.000000e+00 : f32
    %16 = vector.broadcast %cst_6 : f32 to vector<1x8xf32>
    %17 = arith.addf %16, %15 : vector<1x8xf32>
    %cst_7 = arith.constant 2.500000e+00 : f32
    %18 = vector.broadcast %cst_7 : f32 to vector<1x8xf32>
    %19 = arith.mulf %17, %18 : vector<1x8xf32>
    %c0_8 = arith.constant 0 : index
    %c0_9 = arith.constant 0 : index
    %20 = vector.load %arg2[%c0_8, %c0_9] : memref<1x8xf32, #tpu.memory_space<vmem>>, vector<1x8xf32>
    tpu.vector_store %arg2[%c0_8, %c0_9], %19 {strides = array<i32>} : memref<1x8xf32, #tpu.memory_space<vmem>>, vector<1x8xf32>,
    return
  }
}

</mosaic_0001>

<bundles_post_ra>
// kernel: my_loss.1
= control target key start
LH: loop header
LB: loop body
LE: loop exit
PB: predicated region body
PF: predicated region fallthrough
CT: control target
= control target key end

     0   :  { %vm23_vm0 = vcmask 64512   ;;  %vm86_vm4 = vcmask 57344   ;;  %s148_s0 = inlined_call_operand.vmem [shape: f32[32,8], index: 0, kind: input, shape index: {}]   ;;  %s149_s1 = inlined_call_operand.vmem [shape: f32[32,8], index: 1, kind: input, shape index: {}]   ;;  %s150_s2 = inlined_call_operand.vmem [shape: f32[1,8], index: 2, kind: output, shape index: {}]  }
   0x1   :  { %v11_v0 = vld [vmem:[%s148_s0] sm:$0xff]  ;;  %v12_v1 = vld [vmem:[%s148_s0 + $0x8] sm:$0xff]  ;;  %v13_v2 = vld [vmem:[%s148_s0 + $0x10] sm:$0xff] }
   0x2   :  { %v14_v3 = vld [vmem:[%s148_s0 + $0x18] sm:$0xff]  ;;  %v15_v4 = vld [vmem:[%s149_s1] sm:$0xff]  ;;  %v37_v5 = vmul.f32 %v11_v0, %v11_v0  ;;  %v38_v6 = vmul.f32 %v12_v1, %v12_v1  ;;  %v39_v7 = vmul.f32 %v13_v2, %v13_v2  ;;  %v16_v9 = vld [vmem:[%s149_s1 + $0x8] sm:$0xff] }
   0x3   :  { %v40_v8 = vmul.f32 %v14_v3, %v14_v3  ;;  %v17_v10 = vld [vmem:[%s149_s1 + $0x10] sm:$0xff]  ;;  %v18_v11 = vld [vmem:[%s149_s1 + $0x18] sm:$0xff]  ;;  %v54_v14 = vmul.f32 %v15_v4, %v15_v4  ;;  %v19_v17 = vmul.f32 %v15_v4, %v11_v0  ;;  %v20_v18 = vmul.f32 %v16_v9, %v12_v1 }
   0x4   :  { %v41_v12 = vsel %vm23_vm0, %v37_v5, 0.0  ;;  %v42_v13 = vsel %vm23_vm0, %v38_v6, 0.0  ;;  %v44_v16 = vsel %vm23_vm0, %v39_v7, 0.0  ;;  %v55_v21 = vmul.f32 %v16_v9, %v16_v9 }
   0x5   :  { %v43_v15 = vadd.f32 %v42_v13, %v41_v12  ;;  %v46_v19 = vsel %vm23_vm0, %v40_v8, 0.0  ;;  %v56_v22 = vmul.f32 %v17_v10, %v17_v10  ;;  %v57_v23 = vmul.f32 %v18_v11, %v18_v11 }
   0x6   :  { %v58_v24 = vsel %vm23_vm0, %v54_v14, 0.0  ;;  %v59_v26 = vsel %vm23_vm0, %v55_v21, 0.0  ;;  %v21_v28 = vmul.f32 %v17_v10, %v13_v2  ;;  %v24_v30 = vsel %vm23_vm0, %v19_v17, 0.0 }
   0x7   :  { %v45_v20 = vadd.f32 %v44_v16, %v43_v15  ;;  %v61_v27 = vsel %vm23_vm0, %v56_v22, 0.0  ;;  %v60_v29 = vadd.f32 %v59_v26, %v58_v24  ;;  %v25_v31 = vsel %vm23_vm0, %v20_v18, 0.0 }
   0x8   :  { %v63_v33 = vsel %vm23_vm0, %v57_v23, 0.0  ;;  %v26_v36 = vadd.f32 %v25_v31, %v24_v30  ;;  %v22_v38 = vmul.f32 %v18_v11, %v14_v3  ;;  %v27_v39 = vsel %vm23_vm0, %v21_v28, 0.0 }
   0x9   :  { %v47_v25 = vadd.f32 %v46_v19, %v45_v20  ;;  %v62_v34 = vadd.f32 %v61_v27, %v60_v29 }
   0xa   :  { %v28_v43 = vadd.f32 %v27_v39, %v26_v36  ;;  %v29_v45 = vsel %vm23_vm0, %v22_v38, 0.0 }
   0xb   :  { %v48_v32 = vrot.slane %v47_v25, 4  ;;  %v64_v37 = vadd.f32 %v63_v33, %v62_v34 }
   0xc   :  { %v30_v48 = vadd.f32 %v29_v45, %v28_v43 }
   0xd   :  { %v49_v35 = vadd.f32 %v48_v32, %v47_v25  ;;  %v65_v41 = vrot.slane %v64_v37, 4 }
   0xe   :  { %v31_v52 = vrot.slane %v30_v48, 4 }
   0xf   :  { %v50_v40 = vrot.slane %v49_v35, 2  ;;  %v66_v44 = vadd.f32 %v65_v41, %v64_v37 }
  0x10   :  { %v32_v55 = vadd.f32 %v31_v52, %v30_v48 }
  0x11   :  { %v51_v42 = vadd.f32 %v50_v40, %v49_v35  ;;  %v67_v47 = vrot.slane %v66_v44, 2 }
  0x12   :  { %v33_v57 = vrot.slane %v32_v55, 2 }
  0x13   :  { %v52_v46 = vrot.slane %v51_v42, 1  ;;  %v68_v49 = vadd.f32 %v67_v47, %v66_v44 }
  0x14   :  { %v34_v59 = vadd.f32 %v33_v57, %v32_v55 }
  0x15   :  { %v53_v50 = vadd.f32 %v52_v46, %v51_v42  ;;  %v69_v51 = vrot.slane %v68_v49, 1 }
  0x16   :  { %v35_v62 = vrot.slane %v34_v59, 1 }
  0x17   :  { %v70_v53 = vadd.f32 %v69_v51, %v68_v49 }
  0x18   :  { %v36_v1 = vadd.f32 %v35_v62, %v34_v59 }
  0x19   :  { %v71_v54 = vmul.f32 %v70_v53, %v53_v50 }
  0x1b   :  { %v72_v56 = vmax.f32 %v71_v54, 1e-16 }
  0x1d   :  { %92 = vrsqrt.f32 %v72_v56  ;;  %vm79_vm1 = vweird.f32 %v72_v56 }
  0x23   :  { %v93_v58 = vpop.eup %92 }
  0x24   :  { %v74_v60 = vmul.f32 %v93_v58, %v72_v56  ;;  %vm80_vm2 = vweird.f32 %v93_v58 }
  0x25   :  { %vm81_vm3 = vmor %vm79_vm1, %vm80_vm2 }
  0x26   :  { %v75_v61 = vmul.f32 %v93_v58, %v74_v60 }
  0x28   :  { %v76_v63 = vmul.f32 0.5, %v75_v61 }
  0x2a   :  { %v77_v0 = vsub.f32 1.5, %v76_v63 }
  0x2c   :  { %v78_v2 = vmul.f32 %v93_v58, %v77_v0 }
  0x2e   :  { %v82_v3 = vsel %vm81_vm3, %v93_v58, %v78_v2 }
  0x2f   :  { %v83_v4 = vmul.f32 %v82_v3, %v36_v1 }
  0x31   :  { %v84_v5 = vadd.f32 1.0, %v83_v4 }
  0x33   :  { %v85_v6 = vmul.f32 2.5, %v84_v5 }
  0x35   :  { %87 = vst.msk [vmem:[%s150_s2] sm:$0x1] %vm86_vm4, %v85_v6 }

</bundles_post_ra>
